<compile_context>
chip_gen: v5e
topology: v5e:2x2
jax: 0.10.0
libtpu: 0.0.40
codegen_flags: <defaults>
</compile_context>

<pallas_src>
import jax
import jax.numpy as jnp
import numpy as np
from jax.experimental import pallas as pl
from jax.experimental.pallas import tpu as pltpu

# ---- problem sizes (small, consistent with the module) -----------------------
N = 2          # batch
C_IN = 4       # in_channels
C_OUT = 8      # out_channels
L = 16         # sequence length
K = 3          # filter_width
PAD = 1        # padding (filter_width == 3 -> padding=1, matching the module)
EPS = 1e-5
NL = N * L


def convblock_kernel(x_ref, w_ref, v_ref, o_ref, col1, col2):
    """Whole ConvBlock forward, single grid point, everything VMEM resident.

    x_ref : (N, C_IN, L)                 input, PyTorch channels-first layout
    w_ref : (C_OUT, K*C_IN + K*C_OUT)    packed [W1 | W2], im2col weight layout
                                         W[co, k*C + c] = torch_w[co, c, k]
    v_ref : (C_OUT, 6)                   columns: b1, g2, be2, b2, g1, be1
    o_ref : (N, C_OUT, L)                output, PyTorch channels-first layout
    col1  : (K*C_IN,  N*L)               scratch: conv1 im2col slab
    col2  : (K*C_OUT, N*L)               scratch: conv2 im2col slab
    """
    W1 = w_ref[:, : K * C_IN]            # (C_OUT, K*C_IN)
    W2 = w_ref[:, K * C_IN:]             # (C_OUT, K*C_OUT)
    b1, g2, be2 = v_ref[:, 0:1], v_ref[:, 1:2], v_ref[:, 2:3]   # (C_OUT, 1)
    b2, g1, be1 = v_ref[:, 3:4], v_ref[:, 4:5], v_ref[:, 5:6]

    inv_count = 1.0 / float(NL)

    def bn_relu(t, gamma, beta):
        # t: (C_OUT, N*L); training-mode batch stats -> lane-axis reductions.
        mean = jnp.sum(t, axis=1, keepdims=True) * inv_count
        d = t - mean
        var = jnp.sum(d * d, axis=1, keepdims=True) * inv_count   # biased (train-mode BN)
        scale = gamma * jax.lax.rsqrt(var + EPS)
        shift = beta - mean * scale
        return jnp.maximum(t * scale + shift, 0.0)

    def fill_im2col(col, slab_fn, c):
        # col rows: [tap k][channel]; col cols: [batch n][position l].
        # Tap k reads input position l + k - 1 (zero outside [0, L)).
        col[...] = jnp.zeros(col.shape, col.dtype)                 # padding columns
        for n in range(N):
            s = slab_fn(n)                                         # (c, L), channels-first
            col[0 * c:1 * c, n * L + 1:(n + 1) * L] = s[:, : L - 1]   # x[l-1]
            col[1 * c:2 * c, n * L:(n + 1) * L] = s                   # x[l]
            col[2 * c:3 * c, n * L:(n + 1) * L - 1] = s[:, 1:]        # x[l+1]

    # ---- conv1 (single MXU dot) + bn2 + ReLU ---------------------------------
    fill_im2col(col1, lambda n: x_ref[n], C_IN)
    h = jnp.dot(W1, col1[...], preferred_element_type=jnp.float32) + b1   # (C_OUT, N*L)
    h = bn_relu(h, g2, be2)

    # ---- conv2 (single MXU dot) + residual + bn1 + ReLU ----------------------
    fill_im2col(col2, lambda n: h[:, n * L:(n + 1) * L], C_OUT)
    y = h + b2 + jnp.dot(W2, col2[...], preferred_element_type=jnp.float32)
    y = bn_relu(y, g1, be1)

    # ---- output, written directly in the PyTorch (N, C_OUT, L) layout --------
    for n in range(N):
        o_ref[n] = y[:, n * L:(n + 1) * L]


@jax.jit
def convblock_forward(x_ncl, w_packed, v_packed):
    """x_ncl: (N, C_IN, L) float32 (PyTorch NCL layout). Returns (N, C_OUT, L)."""
    vmem = pl.BlockSpec(memory_space=pltpu.MemorySpace.VMEM)
    return pl.pallas_call(
        convblock_kernel,
        out_shape=jax.ShapeDtypeStruct((N, C_OUT, L), jnp.float32),
        in_specs=[vmem, vmem, vmem],
        out_specs=vmem,
        scratch_shapes=[pltpu.VMEM((K * C_IN, NL), jnp.float32),
                        pltpu.VMEM((K * C_OUT, NL), jnp.float32)],
    )(x_ncl, w_packed, v_packed)


def pack_params(w1, b1, g2, be2, w2, b2, g1, be1):
    """One-time packing of PyTorch-layout params into the kernel layout.

    w1: (C_OUT, C_IN, K), w2: (C_OUT, C_OUT, K)   (torch Conv1d weight layout)
    b*, g*, be*: (C_OUT,)
    Returns:
      W: (C_OUT, K*C_IN + K*C_OUT) with W[co, k*C + c] = w[co, c, k]
      V: (C_OUT, 6) columns [b1, g2, be2, b2, g1, be1]
    """
    W1 = jnp.transpose(w1, (0, 2, 1)).reshape(C_OUT, K * C_IN)
    W2 = jnp.transpose(w2, (0, 2, 1)).reshape(C_OUT, K * C_OUT)
    W = jnp.concatenate([W1, W2], axis=1).astype(jnp.float32)
    V = jnp.stack([b1, g2, be2, b2, g1, be1], axis=1).astype(jnp.float32)
    return W, V


def reference_forward(x_ncl, w1, b1, g2, be2, w2, b2, g1, be1):
    """Pure-JAX reference of the same math (for a correctness check)."""
    def conv1d(x, w, b):                       # x: (N, C, L); torch Conv1d, padding=1
        xp = jnp.pad(x, ((0, 0), (0, 0), (PAD, PAD)))
        out = sum(jnp.einsum('ncl,dc->ndl', xp[:, :, k:k + L], w[:, :, k])
                  for k in range(K))
        return out + b[None, :, None]

    def bn(t, g, be):                          # training-mode batch stats, biased var
        m = jnp.mean(t, axis=(0, 2), keepdims=True)
        v = jnp.mean((t - m) ** 2, axis=(0, 2), keepdims=True)
        return (t - m) * jax.lax.rsqrt(v + EPS) * g[None, :, None] + be[None, :, None]

    h = jax.nn.relu(bn(conv1d(x_ncl, w1, b1), g2, be2))
    return jax.nn.relu(bn(conv1d(h, w2, b2) + h, g1, be1))


if __name__ == "__main__":
    key = jax.random.PRNGKey(0)
    k_x, k_w1, k_b1, k_w2, k_b2 = jax.random.split(key, 5)

    # input in PyTorch Conv1d layout (N, C_in, L)
    x = jax.random.normal(k_x, (N, C_IN, L), dtype=jnp.float32)

    # conv weights in PyTorch layout (C_out, C_in, K)
    w1 = 0.2 * jax.random.normal(k_w1, (C_OUT, C_IN, K), dtype=jnp.float32)
    b1 = 0.1 * jax.random.normal(k_b1, (C_OUT,), dtype=jnp.float32)
    w2 = 0.2 * jax.random.normal(k_w2, (C_OUT, C_OUT, K), dtype=jnp.float32)
    b2 = 0.1 * jax.random.normal(k_b2, (C_OUT,), dtype=jnp.float32)
    # BatchNorm affine params: PyTorch defaults (gamma=1, beta=0)
    g1 = jnp.ones((C_OUT,), jnp.float32)
    be1 = jnp.zeros((C_OUT,), jnp.float32)
    g2 = jnp.ones((C_OUT,), jnp.float32)
    be2 = jnp.zeros((C_OUT,), jnp.float32)

    W, V = pack_params(w1, b1, g2, be2, w2, b2, g1, be1)   # once, outside the forward

    out = convblock_forward(x, W, V)
    out = jax.block_until_ready(out)

    ref = reference_forward(x, w1, b1, g2, be2, w2, b2, g1, be1)
    np.testing.assert_allclose(np.asarray(out), np.asarray(ref), rtol=1e-4, atol=1e-4)

    print("KERNEL_OK")
</pallas_src>

<mosaic_0001>
module attributes {stable_mosaic.version = 11 : i64} {
  func.func @convblock_kernel(%arg0: memref<2x4x16xf32, #tpu.memory_space<vmem>>, %arg1: memref<8x36xf32, #tpu.memory_space<vmem>>, %arg2: memref<8x6xf32, #tpu.memory_space<vmem>>, %arg3: memref<2x8x16xf32, #tpu.memory_space<vmem>>, %arg4: memref<12x32xf32, #tpu.memory_space<vmem>>, %arg5: memref<24x32xf32, #tpu.memory_space<vmem>>) attributes {dimension_semantics = [], scalar_prefetch = 0 : i64, scratch_operands = 2 : i64, tpu.core_type = #tpu.core_type<tc>} {
    %c0 = arith.constant 0 : index
    %c0_0 = arith.constant 0 : index
    %0 = vector.load %arg1[%c0, %c0_0] : memref<8x36xf32, #tpu.memory_space<vmem>>, vector<8x12xf32>
    %c0_1 = arith.constant 0 : index
    %c12 = arith.constant 12 : index
    %1 = vector.load %arg1[%c0_1, %c12] : memref<8x36xf32, #tpu.memory_space<vmem>>, vector<8x24xf32>
    %c0_2 = arith.constant 0 : index
    %c0_3 = arith.constant 0 : index
    %2 = vector.load %arg2[%c0_2, %c0_3] : memref<8x6xf32, #tpu.memory_space<vmem>>, vector<8x1xf32>
    %c0_4 = arith.constant 0 : index
    %c1 = arith.constant 1 : index
    %3 = vector.load %arg2[%c0_4, %c1] : memref<8x6xf32, #tpu.memory_space<vmem>>, vector<8x1xf32>
    %c0_5 = arith.constant 0 : index
    %c2 = arith.constant 2 : index
    %4 = vector.load %arg2[%c0_5, %c2] : memref<8x6xf32, #tpu.memory_space<vmem>>, vector<8x1xf32>
    %c0_6 = arith.constant 0 : index
    %c3 = arith.constant 3 : index
    %5 = vector.load %arg2[%c0_6, %c3] : memref<8x6xf32, #tpu.memory_space<vmem>>, vector<8x1xf32>
    %c0_7 = arith.constant 0 : index
    %c4 = arith.constant 4 : index
    %6 = vector.load %arg2[%c0_7, %c4] : memref<8x6xf32, #tpu.memory_space<vmem>>, vector<8x1xf32>
    %c0_8 = arith.constant 0 : index
    %c5 = arith.constant 5 : index
    %7 = vector.load %arg2[%c0_8, %c5] : memref<8x6xf32, #tpu.memory_space<vmem>>, vector<8x1xf32>
    %cst = arith.constant 0.000000e+00 : f32
    %8 = vector.broadcast %cst : f32 to vector<12x32xf32>
    %c0_9 = arith.constant 0 : index
    %c0_10 = arith.constant 0 : index
    %9 = vector.load %arg4[%c0_9, %c0_10] : memref<12x32xf32, #tpu.memory_space<vmem>>, vector<12x32xf32>
    tpu.vector_store %arg4[%c0_9, %c0_10], %8 {strides = array<i32>} : memref<12x32xf32, #tpu.memory_space<vmem>>, vector<12x32xf32>,
    %c0_11 = arith.constant 0 : index
    %c0_12 = arith.constant 0 : index
    %c0_13 = arith.constant 0 : index
    %10 = vector.load %arg0[%c0_11, %c0_12, %c0_13] : memref<2x4x16xf32, #tpu.memory_space<vmem>>, vector<1x4x16xf32>
    %11 = vector.shape_cast %10 : vector<1x4x16xf32> to vector<4x16xf32>
    %12 = vector.extract_strided_slice %11 {offsets = [0, 0], sizes = [4, 15], strides = [1, 1]} : vector<4x16xf32> to vector<4x15xf32>
    %c0_14 = arith.constant 0 : index
    %c1_15 = arith.constant 1 : index
    %13 = vector.load %arg4[%c0_14, %c1_15] : memref<12x32xf32, #tpu.memory_space<vmem>>, vector<4x15xf32>
    tpu.vector_store %arg4[%c0_14, %c1_15], %12 {strides = array<i32>} : memref<12x32xf32, #tpu.memory_space<vmem>>, vector<4x15xf32>,
    %c4_16 = arith.constant 4 : index
    %c0_17 = arith.constant 0 : index
    %14 = vector.load %arg4[%c4_16, %c0_17] : memref<12x32xf32, #tpu.memory_space<vmem>>, vector<4x16xf32>
    tpu.vector_store %arg4[%c4_16, %c0_17], %11 {strides = array<i32>} : memref<12x32xf32, #tpu.memory_space<vmem>>, vector<4x16xf32>,
    %15 = vector.extract_strided_slice %11 {offsets = [0, 1], sizes = [4, 15], strides = [1, 1]} : vector<4x16xf32> to vector<4x15xf32>
    %c8 = arith.constant 8 : index
    %c0_18 = arith.constant 0 : index
    %16 = vector.load %arg4[%c8, %c0_18] : memref<12x32xf32, #tpu.memory_space<vmem>>, vector<4x15xf32>
    tpu.vector_store %arg4[%c8, %c0_18], %15 {strides = array<i32>} : memref<12x32xf32, #tpu.memory_space<vmem>>, vector<4x15xf32>,
    %c1_19 = arith.constant 1 : index
    %c0_20 = arith.constant 0 : index
    %c0_21 = arith.constant 0 : index
    %17 = vector.load %arg0[%c1_19, %c0_20, %c0_21] : memref<2x4x16xf32, #tpu.memory_space<vmem>>, vector<1x4x16xf32>
    %18 = vector.shape_cast %17 : vector<1x4x16xf32> to vector<4x16xf32>
    %19 = vector.extract_strided_slice %18 {offsets = [0, 0], sizes = [4, 15], strides = [1, 1]} : vector<4x16xf32> to vector<4x15xf32>
    %c0_22 = arith.constant 0 : index
    %c17 = arith.constant 17 : index
    %20 = vector.load %arg4[%c0_22, %c17] : memref<12x32xf32, #tpu.memory_space<vmem>>, vector<4x15xf32>
    tpu.vector_store %arg4[%c0_22, %c17], %19 {strides = array<i32>} : memref<12x32xf32, #tpu.memory_space<vmem>>, vector<4x15xf32>,
    %c4_23 = arith.constant 4 : index
    %c16 = arith.constant 16 : index
    %21 = vector.load %arg4[%c4_23, %c16] : memref<12x32xf32, #tpu.memory_space<vmem>>, vector<4x16xf32>
    tpu.vector_store %arg4[%c4_23, %c16], %18 {strides = array<i32>} : memref<12x32xf32, #tpu.memory_space<vmem>>, vector<4x16xf32>,
    %22 = vector.extract_strided_slice %18 {offsets = [0, 1], sizes = [4, 15], strides = [1, 1]} : vector<4x16xf32> to vector<4x15xf32>
    %c8_24 = arith.constant 8 : index
    %c16_25 = arith.constant 16 : index
    %23 = vector.load %arg4[%c8_24, %c16_25] : memref<12x32xf32, #tpu.memory_space<vmem>>, vector<4x15xf32>
    tpu.vector_store %arg4[%c8_24, %c16_25], %22 {strides = array<i32>} : memref<12x32xf32, #tpu.memory_space<vmem>>, vector<4x15xf32>,
    %c0_26 = arith.constant 0 : index
    %c0_27 = arith.constant 0 : index
    %24 = vector.load %arg4[%c0_26, %c0_27] : memref<12x32xf32, #tpu.memory_space<vmem>>, vector<12x32xf32>
    %cst_28 = arith.constant dense<0.000000e+00> : vector<8x32xf32>
    %25 = tpu.matmul %0, %24, %cst_28 {dimension_numbers = #tpu.dot_dimension_numbers<[1], [0], [0], [1], [0, 0, 1, 1], [], []>} : vector<8x12xf32>, vector<12x32xf32>, vector<8x32xf32> -> vector<8x32xf32>
    %26 = vector.broadcast %2 : vector<8x1xf32> to vector<8x32xf32>
    %27 = arith.addf %25, %26 : vector<8x32xf32>
    %cst_29 = arith.constant dense<0.000000e+00> : vector<8xf32>
    %28 = vector.multi_reduction <add>, %27, %cst_29 [1] : vector<8x32xf32> to vector<8xf32>
    %29 = vector.shape_cast %28 : vector<8xf32> to vector<8x1xf32>
    %cst_30 = arith.constant 3.125000e-02 : f32
    %30 = vector.broadcast %cst_30 : f32 to vector<8x1xf32>
    %31 = arith.mulf %29, %30 : vector<8x1xf32>
    %32 = vector.broadcast %31 : vector<8x1xf32> to vector<8x32xf32>
    %33 = arith.subf %27, %32 : vector<8x32xf32>
    %34 = arith.mulf %33, %33 : vector<8x32xf32>
    %cst_31 = arith.constant dense<0.000000e+00> : vector<8xf32>
    %35 = vector.multi_reduction <add>, %34, %cst_31 [1] : vector<8x32xf32> to vector<8xf32>
    %36 = vector.shape_cast %35 : vector<8xf32> to vector<8x1xf32>
    %cst_32 = arith.constant 3.125000e-02 : f32
    %37 = vector.broadcast %cst_32 : f32 to vector<8x1xf32>
    %38 = arith.mulf %36, %37 : vector<8x1xf32>
    %cst_33 = arith.constant 9.99999974E-6 : f32
    %39 = vector.broadcast %cst_33 : f32 to vector<8x1xf32>
    %40 = arith.addf %38, %39 : vector<8x1xf32>
    %41 = math.rsqrt %40 : vector<8x1xf32>
    %42 = arith.mulf %3, %41 : vector<8x1xf32>
    %43 = arith.mulf %31, %42 : vector<8x1xf32>
    %44 = arith.subf %4, %43 : vector<8x1xf32>
    %45 = vector.broadcast %42 : vector<8x1xf32> to vector<8x32xf32>
    %46 = arith.mulf %27, %45 : vector<8x32xf32>
    %47 = vector.broadcast %44 : vector<8x1xf32> to vector<8x32xf32>
    %48 = arith.addf %46, %47 : vector<8x32xf32>
    %cst_34 = arith.constant 0.000000e+00 : f32
    %49 = vector.broadcast %cst_34 : f32 to vector<8x32xf32>
    %50 = arith.maximumf %48, %49 : vector<8x32xf32>
    %cst_35 = arith.constant 0.000000e+00 : f32
    %51 = vector.broadcast %cst_35 : f32 to vector<24x32xf32>
    %c0_36 = arith.constant 0 : index
    %c0_37 = arith.constant 0 : index
    %52 = vector.load %arg5[%c0_36, %c0_37] : memref<24x32xf32, #tpu.memory_space<vmem>>, vector<24x32xf32>
    tpu.vector_store %arg5[%c0_36, %c0_37], %51 {strides = array<i32>} : memref<24x32xf32, #tpu.memory_space<vmem>>, vector<24x32xf32>,
    %53 = vector.extract_strided_slice %50 {offsets = [0, 0], sizes = [8, 16], strides = [1, 1]} : vector<8x32xf32> to vector<8x16xf32>
    %54 = vector.extract_strided_slice %53 {offsets = [0, 0], sizes = [8, 15], strides = [1, 1]} : vector<8x16xf32> to vector<8x15xf32>
    %c0_38 = arith.constant 0 : index
    %c1_39 = arith.constant 1 : index
    %55 = vector.load %arg5[%c0_38, %c1_39] : memref<24x32xf32, #tpu.memory_space<vmem>>, vector<8x15xf32>
    tpu.vector_store %arg5[%c0_38, %c1_39], %54 {strides = array<i32>} : memref<24x32xf32, #tpu.memory_space<vmem>>, vector<8x15xf32>,
    %c8_40 = arith.constant 8 : index
    %c0_41 = arith.constant 0 : index
    %56 = vector.load %arg5[%c8_40, %c0_41] : memref<24x32xf32, #tpu.memory_space<vmem>>, vector<8x16xf32>
    tpu.vector_store %arg5[%c8_40, %c0_41], %53 {strides = array<i32>} : memref<24x32xf32, #tpu.memory_space<vmem>>, vector<8x16xf32>,
    %57 = vector.extract_strided_slice %53 {offsets = [0, 1], sizes = [8, 15], strides = [1, 1]} : vector<8x16xf32> to vector<8x15xf32>
    %c16_42 = arith.constant 16 : index
    %c0_43 = arith.constant 0 : index
    %58 = vector.load %arg5[%c16_42, %c0_43] : memref<24x32xf32, #tpu.memory_space<vmem>>, vector<8x15xf32>
    tpu.vector_store %arg5[%c16_42, %c0_43], %57 {strides = array<i32>} : memref<24x32xf32, #tpu.memory_space<vmem>>, vector<8x15xf32>,
    %59 = vector.extract_strided_slice %50 {offsets = [0, 16], sizes = [8, 16], strides = [1, 1]} : vector<8x32xf32> to vector<8x16xf32>
    %60 = vector.extract_strided_slice %59 {offsets = [0, 0], sizes = [8, 15], strides = [1, 1]} : vector<8x16xf32> to vector<8x15xf32>
    %c0_44 = arith.constant 0 : index
    %c17_45 = arith.constant 17 : index
    %61 = vector.load %arg5[%c0_44, %c17_45] : memref<24x32xf32, #tpu.memory_space<vmem>>, vector<8x15xf32>
    tpu.vector_store %arg5[%c0_44, %c17_45], %60 {strides = array<i32>} : memref<24x32xf32, #tpu.memory_space<vmem>>, vector<8x15xf32>,
    %c8_46 = arith.constant 8 : index
    %c16_47 = arith.constant 16 : index
    %62 = vector.load %arg5[%c8_46, %c16_47] : memref<24x32xf32, #tpu.memory_space<vmem>>, vector<8x16xf32>
    tpu.vector_store %arg5[%c8_46, %c16_47], %59 {strides = array<i32>} : memref<24x32xf32, #tpu.memory_space<vmem>>, vector<8x16xf32>,
    %63 = vector.extract_strided_slice %59 {offsets = [0, 1], sizes = [8, 15], strides = [1, 1]} : vector<8x16xf32> to vector<8x15xf32>
    %c16_48 = arith.constant 16 : index
    %c16_49 = arith.constant 16 : index
    %64 = vector.load %arg5[%c16_48, %c16_49] : memref<24x32xf32, #tpu.memory_space<vmem>>, vector<8x15xf32>
    tpu.vector_store %arg5[%c16_48, %c16_49], %63 {strides = array<i32>} : memref<24x32xf32, #tpu.memory_space<vmem>>, vector<8x15xf32>,
    %65 = vector.broadcast %5 : vector<8x1xf32> to vector<8x32xf32>
    %66 = arith.addf %50, %65 : vector<8x32xf32>
    %c0_50 = arith.constant 0 : index
    %c0_51 = arith.constant 0 : index
    %67 = vector.load %arg5[%c0_50, %c0_51] : memref<24x32xf32, #tpu.memory_space<vmem>>, vector<24x32xf32>
    %cst_52 = arith.constant dense<0.000000e+00> : vector<8x32xf32>
    %68 = tpu.matmul %1, %67, %cst_52 {dimension_numbers = #tpu.dot_dimension_numbers<[1], [0], [0], [1], [0, 0, 1, 1], [], []>} : vector<8x24xf32>, vector<24x32xf32>, vector<8x32xf32> -> vector<8x32xf32>
    %69 = arith.addf %66, %68 : vector<8x32xf32>
    %cst_53 = arith.constant dense<0.000000e+00> : vector<8xf32>
    %70 = vector.multi_reduction <add>, %69, %cst_53 [1] : vector<8x32xf32> to vector<8xf32>
    %71 = vector.shape_cast %70 : vector<8xf32> to vector<8x1xf32>
    %cst_54 = arith.constant 3.125000e-02 : f32
    %72 = vector.broadcast %cst_54 : f32 to vector<8x1xf32>
    %73 = arith.mulf %71, %72 : vector<8x1xf32>
    %74 = vector.broadcast %73 : vector<8x1xf32> to vector<8x32xf32>
    %75 = arith.subf %69, %74 : vector<8x32xf32>
    %76 = arith.mulf %75, %75 : vector<8x32xf32>
    %cst_55 = arith.constant dense<0.000000e+00> : vector<8xf32>
    %77 = vector.multi_reduction <add>, %76, %cst_55 [1] : vector<8x32xf32> to vector<8xf32>
    %78 = vector.shape_cast %77 : vector<8xf32> to vector<8x1xf32>
    %cst_56 = arith.constant 3.125000e-02 : f32
    %79 = vector.broadcast %cst_56 : f32 to vector<8x1xf32>
    %80 = arith.mulf %78, %79 : vector<8x1xf32>
    %cst_57 = arith.constant 9.99999974E-6 : f32
    %81 = vector.broadcast %cst_57 : f32 to vector<8x1xf32>
    %82 = arith.addf %80, %81 : vector<8x1xf32>
    %83 = math.rsqrt %82 : vector<8x1xf32>
    %84 = arith.mulf %6, %83 : vector<8x1xf32>
    %85 = arith.mulf %73, %84 : vector<8x1xf32>
    %86 = arith.subf %7, %85 : vector<8x1xf32>
    %87 = vector.broadcast %84 : vector<8x1xf32> to vector<8x32xf32>
    %88 = arith.mulf %69, %87 : vector<8x32xf32>
    %89 = vector.broadcast %86 : vector<8x1xf32> to vector<8x32xf32>
    %90 = arith.addf %88, %89 : vector<8x32xf32>
    %cst_58 = arith.constant 0.000000e+00 : f32
    %91 = vector.broadcast %cst_58 : f32 to vector<8x32xf32>
    %92 = arith.maximumf %90, %91 : vector<8x32xf32>
    %93 = vector.extract_strided_slice %92 {offsets = [0, 0], sizes = [8, 16], strides = [1, 1]} : vector<8x32xf32> to vector<8x16xf32>
    %c0_59 = arith.constant 0 : index
    %c0_60 = arith.constant 0 : index
    %c0_61 = arith.constant 0 : index
    %94 = vector.load %arg3[%c0_59, %c0_60, %c0_61] : memref<2x8x16xf32, #tpu.memory_space<vmem>>, vector<1x8x16xf32>
    %95 = vector.shape_cast %94 : vector<1x8x16xf32> to vector<8x16xf32>
    %96 = vector.shape_cast %93 : vector<8x16xf32> to vector<1x8x16xf32>
    tpu.vector_store %arg3[%c0_59, %c0_60, %c0_61], %96 {strides = array<i32>} : memref<2x8x16xf32, #tpu.memory_space<vmem>>, vector<1x8x16xf32>,
    %97 = vector.extract_strided_slice %92 {offsets = [0, 16], sizes = [8, 16], strides = [1, 1]} : vector<8x32xf32> to vector<8x16xf32>
    %c1_62 = arith.constant 1 : index
    %c0_63 = arith.constant 0 : index
    %c0_64 = arith.constant 0 : index
    %98 = vector.load %arg3[%c1_62, %c0_63, %c0_64] : memref<2x8x16xf32, #tpu.memory_space<vmem>>, vector<1x8x16xf32>
    %99 = vector.shape_cast %98 : vector<1x8x16xf32> to vector<8x16xf32>
    %100 = vector.shape_cast %97 : vector<8x16xf32> to vector<1x8x16xf32>
    tpu.vector_store %arg3[%c1_62, %c0_63, %c0_64], %100 {strides = array<i32>} : memref<2x8x16xf32, #tpu.memory_space<vmem>>, vector<1x8x16xf32>,
    return
  }
}

</mosaic_0001>

<bundles_post_ra>
// kernel: convblock_forward.1
= control target key start
LH: loop header
LB: loop body
LE: loop exit
PB: predicated region body
PF: predicated region fallthrough
CT: control target
= control target key end

     0   :  { %8 = vsyncpa [#allocation5], 0  ;;  %s512_s0 = inlined_call_operand.hbm [shape: f32[2,4,16], index: 0, kind: input, shape index: {}]   ;;  %s513_s1 = inlined_call_operand.hbm [shape: f32[8,36], index: 1, kind: input, shape index: {}]   ;;  %s514_s2 = inlined_call_operand.hbm [shape: f32[8,6], index: 2, kind: input, shape index: {}]   ;;  %s515_s3 = inlined_call_operand.hbm [shape: f32[2,8,16], index: 3, kind: output, shape index: {}]  }
   0x1   :  { %9 = vsyncpa [#allocation8], 0  ;;  %s29_s14 = sshll.u32 %s513_s1, 4  ;;  %s30_s14 = int_to_ptr.hbm [resolvable:$true] %s29_s14 }
   0x2   :  { %10 = vsyncpa [#allocation6], 0  ;;  %s433_s15 = smov [#allocation7]   ;;  %s15_s19 = sshll.u32 %s512_s0, 4  ;;  %s16_s19 = int_to_ptr.hbm [resolvable:$true] %s15_s19 }
   0x3   :  { %s31_s16 = sshll.u32 %s433_s15, 4  ;;  %s434_s20 = smov [#allocation4]   ;;  %s32_s16 = int_to_ptr.vmem [resolvable:$true] %s31_s16 }
   0x4   :  { %34 = dma.hbm_to_vmem [thread:$0]  %s30_s14, 128, %s32_s16, [#allocation8]  }
   0x5   :  { %s17_s21 = sshll.u32 %s434_s20, 4  ;;  %s435_s22 = smov 64   ;;  %s18_s21 = int_to_ptr.vmem [resolvable:$true] %s17_s21 }
   0x6   :  { %s436_s23 = smov 4   ;;  %s40_s1 = sshll.u32 %s514_s2, 4  ;;  %s41_s1 = int_to_ptr.hbm [resolvable:$true] %s40_s1 }
   0x7   :  { %23 = dma.hbm_to_vmem [thread:$0]  %s16_s19, 128, %s18_s21, [#allocation5], %s435_s22, %s435_s22, %s436_s23  }
   0x8   :  { %s437_s26 = smov [#allocation9]  }
   0x9   :  { %s42_s27 = sshll.u32 %s437_s26, 4  ;;  %s43_s27 = int_to_ptr.vmem [resolvable:$true] %s42_s27 }
   0xa   :  { %45 = dma.hbm_to_vmem [thread:$0]  %s41_s1, 128, %s43_s27, [#allocation8]  }
   0xb   :  { %427 = dma.done.wait [#allocation5], 128  }
   0xc   :  { %428 = vsyncadd [#allocation5], 4294967168 }
   0xd   :  { %429 = dma.done.wait [#allocation8], 256  }
   0xe   :  { %430 = vsyncadd [#allocation8], 4294967040  ;;  %vm60_vm0 = vcmask 261120   ;;  %v438_v0 = vmov 0.0   ;;  %vm62_vm1 = vcmask 257024   ;;  %vm71_vm2 = vcmask 125952  }
   0xf   :  { %61 = vst.msk [vmem:[#allocation2] sm:$0xff] %vm60_vm0, %v438_v0  ;;  %v64_v1 = vld [vmem:[#allocation4] sm:$0xf]  ;;  %s439_s0 = smov 127   ;;  %s440_s2 = smov 1   ;;  %vm89_vm3 = vcmask 257152  }
  0x10   :  { %172 = vst.msk [vmem:[#allocation3] sm:$0xff] %vm60_vm0, %v438_v0  ;;  %73 = vrot.lane.b32.xlu0 %v64_v1, %s439_s0  ;;  %66 = vrot.lane.b32.xlu1 %v64_v1, %s440_s2  ;;  %v79_v2 = vld [vmem:[#allocation4 + $0x4] sm:$0xf]  ;;  %s441_s28 = smov 16   ;;  %s442_s29 = smov 15   ;;  %v490_v4 = vld [vmem:[#allocation9] sm:$0xff] }
  0x11   :  { %173 = vst.msk [vmem:[#allocation3 + $0x8] sm:$0xff] %vm60_vm0, %v438_v0  ;;  %86 = vrot.lane.b32.xlu2 %v79_v2, %s441_s28  ;;  %s443_s30 = smov 17   ;;  %v444_v5 = vmov 0   ;;  %vm76_vm4 = vcmask 117760   ;;  %vm69_vm5 = vcmask 125960   ;;  %vm94_vm6 = vcmask 248960  }
  0x12   :  { %174 = vst.msk [vmem:[#allocation3 + $0x10] sm:$0xff] %vm60_vm0, %v438_v0  ;;  %321 = vset.pattern.permute.xlu2 %v444_v5  ;;  %vm84_vm7 = vcmask 257160   ;;  %vm107_vm8 = vcmask 1043456   ;;  %v58_v12 = vld [vmem:[#allocation7] sm:$0xff]  ;;  %vm103_vm9 = vcmask 97280   ;;  %v445_v22 = vmov 1  }
  0x13   :  { %63 = vst.msk [vmem:[#allocation2 + $0x8] sm:$0xf] %vm62_vm1, %v438_v0  ;;  %v446_v26 = vmov 3   ;;  %v447_v36 = vmov 2   ;;  %vm181_vm13 = vcmask 130048   ;;  %vm190_vm14 = vcmask 261248  }
  0x14   :  { %72 = vst.msk [vmem:[#allocation2 + $0x4] sm:$0xf] %vm71_vm2, %v64_v1  ;;  %324 = vset.pattern.permute.xlu0 %v446_v26  ;;  %s448_s4 = smov 116   ;;  %vm186_vm15 = vcmask 121856   ;;  %vm192_vm1 = vcmask 253056   ;;  %vm179_vm2 = vcmask 130056  }
  0x15   :  { %v449_v60 = vmov 4   ;;  %s451_s5 = smov 112   ;;  %s452_s6 = smov [#allocation10]  }
  0x16   :  { %325 = vset.pattern.permute.xlu1 %v449_v60  ;;  %s280_s7 = sshll.u32 %s452_s6, 4  ;;  %s282_s10 = sshll.u32 %s515_s3, 4  ;;  %s281_s7 = int_to_ptr.vmem [resolvable:$true] %s280_s7  ;;  %s283_s10 = int_to_ptr.hbm [resolvable:$true] %s282_s10 }
  0x17   :  { %s453_s11 = smov 128   ;;  %s454_s12 = smov 8  }
  0x18   :  { %91 = vrot.lane.b32.xlu0 %v79_v2, %s442_s29  ;;  %81 = vrot.lane.b32.xlu1 %v79_v2, %s443_s30 }
  0x19   :  { %100 = vperm.xlu2 %321, %v490_v4  }
  0x21   :  { %322 = vset.pattern.permute.xlu2 %v445_v22 }
  0x6b   :  { %v87_v3 = vpop.permute.xlu2 %86 }
  0x6c   :  { %90 = vst.msk [vmem:[#allocation2 + $0x4] sm:$0xf] %vm89_vm3, %v87_v3  ;;  %vm188_vm3 = vcmask 261256  }
  0x73   :  { %v101_v13 = vpop.permute.xlu2 %100 }
  0x82   :  { %v74_v6 = vpop.permute.xlu0 %73  ;;  %v67_v7 = vpop.permute.xlu1 %66 }
  0x83   :  { %77 = vst.msk [vmem:[#allocation2 + $0x8] sm:$0xf] %vm76_vm4, %v74_v6  ;;  %vm204_vm4 = vcmask 195584  }
  0x84   :  { %70 = vst.msk [vmem:[#allocation2] sm:$0xf] %vm69_vm5, %v67_v7 }
  0x8a   :  { %v92_v8 = vpop.permute.xlu0 %91  ;;  %v82_v9 = vpop.permute.xlu1 %81 }
  0x8b   :  { %95 = vst.msk [vmem:[#allocation2 + $0x8] sm:$0xf] %vm94_vm6, %v92_v8 }
  0x8c   :  { %85 = vst.msk [vmem:[#allocation2] sm:$0xf] %vm84_vm7, %v82_v9 }
  0x92   :  { %v97_v10 = vld [vmem:[#allocation2 + $0x8] sm:$0xf] }
  0x93   :  { %296 = vmatpush.msk.msra.mxu0 %vm107_vm8, %v97_v10  ;;  %v96_v11 = vld [vmem:[#allocation2] sm:$0xff]  ;;  %v450_v10 = vmov 5  }
  0x95   :  { %126 = vmatpush.msra.mxu0 %v96_v11 }
  0x96   :  { %297 = vmatmul.msk.f32.vlgmr.msra.gmra.mxu0 %vm103_vm9, %v58_v12 }
 0x113   :  { %v128_v14 = vpop.f32.mrf.mxu0 }
 0x114   :  { %v129_v15 = vadd.f32 %v128_v14, %v101_v13 }
 0x116   :  { %v131_v16 = vsel %vm60_vm0, %v129_v15, 0.0 }
 0x117   :  { %132 = vadd.xlane.f32.xlu0 %v131_v16 }
 0x12b   :  { %195 = vperm.xlu0 %324, %v490_v4  }
 0x133   :  { %326 = vset.pattern.permute.xlu0 %v450_v10 }
 0x18a   :  { %v133_v17 = vpop.xlane.xlu0 %132 }
 0x18b   :  { %v134_v18 = vmul.f32 0.03125, %v133_v17 }
 0x18d   :  { %v135_v19 = vsub.f32 %v129_v15, %v134_v18 }
 0x18f   :  { %v136_v20 = vmul.f32 %v135_v19, %v135_v19 }
 0x191   :  { %v137_v21 = vsel %vm60_vm0, %v136_v20, 0.0 }
 0x192   :  { %138 = vadd.xlane.f32.xlu1 %v137_v21 }
 0x19d   :  { %v196_v50 = vpop.permute.xlu0 %195 }
 0x205   :  { %v139_v23 = vpop.xlane.xlu1 %138 }
 0x206   :  { %v140_v24 = vmul.f32 0.03125, %v139_v23 }
 0x208   :  { %v141_v25 = vadd.f32 1e-05, %v140_v24 }
 0x20a   :  { %327 = vrsqrt.f32 %v141_v25  ;;  %vm148_vm11 = vweird.f32 %v141_v25 }
 0x210   :  { %v328_v27 = vpop.eup %327 }
 0x211   :  { %v143_v28 = vmul.f32 %v328_v27, %v141_v25  ;;  %vm149_vm10 = vweird.f32 %v328_v27 }
 0x212   :  { %vm150_vm12 = vmor %vm148_vm11, %vm149_vm10 }
 0x213   :  { %v144_v29 = vmul.f32 %v328_v27, %v143_v28 }
 0x215   :  { %v145_v30 = vmul.f32 0.5, %v144_v29 }
 0x217   :  { %v146_v31 = vsub.f32 1.5, %v145_v30 }
 0x219   :  { %v147_v32 = vmul.f32 %v328_v27, %v146_v31 }
 0x21b   :  { %v151_v33 = vsel %vm150_vm12, %v328_v27, %v147_v32 }
 0x21c   :  { %v152_v34 = vmul.f32 %v151_v33, %v490_v4 }
 0x21e   :  { %v153_v35 = vmul.f32 %v152_v34, %v134_v18 }
 0x220   :  { %155 = vrot.lane.b32.xlu2 %v153_v35, %s440_s2 }
 0x228   :  { %161 = vperm.xlu2 %322, %v152_v34  }
 0x230   :  { %323 = vset.pattern.permute.xlu2 %v447_v36 }
 0x27a   :  { %v156_v37 = vpop.permute.xlu2 %155 }
 0x27b   :  { %v158_v38 = vsub.f32 %v490_v4, %v156_v37 }
 0x27d   :  { %167 = vperm.xlu2 %323, %v158_v38  }
 0x282   :  { %v162_v39 = vpop.permute.xlu2 %161 }
 0x283   :  { %v164_v40 = vmul.f32 %v162_v39, %v129_v15 }
 0x2d7   :  { %v168_v41 = vpop.permute.xlu2 %167 }
 0x2d8   :  { %v170_v42 = vadd.f32 %v168_v41, %v164_v40 }
 0x2da   :  { %v171_v43 = vmax.f32 %v170_v42, 0.0 }
 0x2dc   :  { %182 = vst.msk [vmem:[#allocation3 + $0x8] sm:$0xff] %vm181_vm13, %v171_v43  ;;  %183 = vrot.lane.b32.xlu2 %v171_v43, %s439_s0  ;;  %v198_v51 = vadd.f32 %v196_v50, %v171_v43 }
 0x2dd   :  { %191 = vst.msk [vmem:[#allocation3 + $0x8] sm:$0xff] %vm190_vm14, %v171_v43 }
 0x2e4   :  { %176 = vrot.lane.b32.xlu2 %v171_v43, %s440_s2  ;;  %v200_v47 = vld [vmem:[#allocation3 + $0x8] sm:$0xff] }
 0x2ec   :  { %202 = vrot.lane.b32.xlu2 %v58_v12, %s448_s4 }
 0x336   :  { %v184_v44 = vpop.permute.xlu2 %183 }
 0x337   :  { %187 = vst.msk [vmem:[#allocation3 + $0x10] sm:$0xff] %vm186_vm15, %v184_v44 }
 0x338   :  { %193 = vst.msk [vmem:[#allocation3 + $0x10] sm:$0xff] %vm192_vm1, %v184_v44 }
 0x33e   :  { %v177_v45 = vpop.permute.xlu2 %176 }
 0x33f   :  { %180 = vst.msk [vmem:[#allocation3] sm:$0xff] %vm179_vm2, %v177_v45  ;;  %v201_v46 = vld [vmem:[#allocation3 + $0x10] sm:$0xff] }
 0x340   :  { %189 = vst.msk [vmem:[#allocation3] sm:$0xff] %vm188_vm3, %v177_v45  ;;  %220 = vmatpush.msra.mxu1 %v201_v46 }
 0x342   :  { %221 = vmatpush.msra.mxu1 %v200_v47 }
 0x346   :  { %v203_v48 = vpop.permute.xlu2 %202 }
 0x347   :  { %v199_v49 = vld [vmem:[#allocation3] sm:$0xff] }
 0x348   :  { %222 = vmatpush.msra.mxu1 %v199_v49 }
 0x349   :  { %298 = vmatmul.msk.f32.vlgmr.msra.gmra.mxu1 %vm204_vm4, %v203_v48 }
 0x3c6   :  { %v224_v52 = vpop.f32.mrf.mxu1 }
 0x3c7   :  { %v227_v53 = vadd.f32 %v224_v52, %v198_v51 }
 0x3c9   :  { %v228_v54 = vsel %vm60_vm0, %v227_v53, 0.0 }
 0x3ca   :  { %229 = vadd.xlane.f32.xlu1 %v228_v54 }
 0x43d   :  { %v230_v55 = vpop.xlane.xlu1 %229 }
 0x43e   :  { %v231_v56 = vmul.f32 0.03125, %v230_v55 }
 0x440   :  { %v232_v57 = vsub.f32 %v227_v53, %v231_v56 }
 0x442   :  { %v233_v58 = vmul.f32 %v232_v57, %v232_v57 }
 0x444   :  { %v234_v59 = vsel %vm60_vm0, %v233_v58, 0.0 }
 0x445   :  { %235 = vadd.xlane.f32.xlu2 %v234_v59 }
 0x4b8   :  { %v236_v61 = vpop.xlane.xlu2 %235 }
 0x4b9   :  { %v237_v62 = vmul.f32 0.03125, %v236_v61 }
 0x4bb   :  { %v238_v63 = vadd.f32 1e-05, %v237_v62 }
 0x4bd   :  { %329 = vrsqrt.f32 %v238_v63  ;;  %vm245_vm6 = vweird.f32 %v238_v63 }
 0x4c3   :  { %v330_v0 = vpop.eup %329 }
 0x4c4   :  { %v240_v1 = vmul.f32 %v330_v0, %v238_v63  ;;  %vm246_vm5 = vweird.f32 %v330_v0 }
 0x4c5   :  { %vm247_vm7 = vmor %vm245_vm6, %vm246_vm5 }
 0x4c6   :  { %v241_v2 = vmul.f32 %v330_v0, %v240_v1 }
 0x4c8   :  { %v242_v3 = vmul.f32 0.5, %v241_v2 }
 0x4ca   :  { %v243_v5 = vsub.f32 1.5, %v242_v3 }
 0x4cc   :  { %v244_v6 = vmul.f32 %v330_v0, %v243_v5 }
 0x4ce   :  { %v248_v7 = vsel %vm247_vm7, %v330_v0, %v244_v6 }
 0x4cf   :  { %v249_v8 = vmul.f32 %v248_v7, %v490_v4 }
 0x4d1   :  { %v250_v9 = vmul.f32 %v249_v8, %v231_v56 }
 0x4d3   :  { %252 = vrot.lane.b32.xlu1 %v250_v9, %s440_s2 }
 0x4db   :  { %258 = vperm.xlu1 %325, %v249_v8  }
 0x545   :  { %v253_v11 = vpop.permute.xlu1 %252 }
 0x546   :  { %v255_v12 = vsub.f32 %v490_v4, %v253_v11 }
 0x548   :  { %264 = vperm.xlu0 %326, %v255_v12  }
 0x54d   :  { %v259_v13 = vpop.permute.xlu1 %258 }
 0x54e   :  { %v261_v14 = vmul.f32 %v259_v13, %v227_v53 }
 0x5ba   :  { %v265_v15 = vpop.permute.xlu0 %264 }
 0x5bb   :  { %v267_v16 = vadd.f32 %v265_v15, %v261_v14 }
 0x5bd   :  { %v268_v17 = vmax.f32 %v267_v16, 0.0 }
 0x5bf   :  { %269 = vst.msk [vmem:[#allocation10] sm:$0xff] %vm181_vm13, %v268_v17  ;;  %271 = vrot.lane.b32.xlu1 %v268_v17, %s451_s5 }
 0x631   :  { %v272_v18 = vpop.permute.xlu1 %271 }
 0x632   :  { %275 = vst.msk [vmem:[#allocation10 + $0x8] sm:$0xff] %vm181_vm13, %v272_v18 }
 0x633   :  { %288 = dma.vmem_to_hbm [thread:$0]  %s281_s7, 256, %s283_s10, [#allocation6], %s453_s11, %s453_s11, %s454_s12  }
 0x634   :  { %431 = dma.done.wait [#allocation6], 256  }
 0x635   :  { %432 = vsyncadd [#allocation6], 4294967040 }
 0x636   :  { %293 = vsyncpa [#allocation5], 1 }
 0x637   :  { %294 = vsyncpa [#allocation8], 1 }
 0x638   :  { %295 = vsyncpa [#allocation6], 1 }

</bundles_post_ra>
